<compile_context>
chip_gen: v7x
topology: tpu7x:2x2x1
jax: 0.10.0
libtpu: 0.0.40
codegen_flags: <defaults>
</compile_context>

<pallas_src>
import jax
import jax.numpy as jnp
from jax.experimental import pallas as pl
from jax.experimental.pallas import tpu as pltpu


def mlp_act_kernel(xT_ref, w1_ref, b1_ref, w2_ref, b2_ref, qT_ref, act_ref):
    # Layer 1: bf16 MXU matmul (cast in-kernel), f32 accumulate, f32 bias+tanh.
    xT = xT_ref[...].astype(jnp.bfloat16)                    # (in, tb)
    w1 = w1_ref[...].astype(jnp.bfloat16)                    # (hidden, in)
    hT = jnp.dot(w1, xT, preferred_element_type=jnp.float32) + b1_ref[...]
    hT = jnp.tanh(hT)                                        # (hidden, tb) f32

    # Layer 2: Q-values, transposed (n_actions, tb).
    w2 = w2_ref[...].astype(jnp.bfloat16)                    # (n_act, hidden)
    qT = jnp.dot(w2, hT.astype(jnp.bfloat16),
                 preferred_element_type=jnp.float32) + b2_ref[...]
    qT_ref[...] = qT.astype(qT_ref.dtype)                    # lane-dense store

    # Fused greedy `act`, lane-dense (1, tb) int32 output.
    n_act = qT.shape[0]
    if n_act == 2:
        # argmax over 2 actions == single compare; ties (and NaN) -> action 0,
        # matching jnp.argmax "first max" semantics.
        act_ref[...] = (qT[1:2, :] > qT[0:1, :]).astype(act_ref.dtype)
    else:
        # General fallback (sublane reduce over n_act rows).
        row = jax.lax.broadcasted_iota(jnp.int32, qT.shape, dimension=0)
        q_max = jnp.max(qT, axis=0, keepdims=True)
        idx = jnp.min(jnp.where(qT == q_max, row, n_act), axis=0, keepdims=True)
        act_ref[...] = idx.astype(act_ref.dtype)


def dqn_forward(x, w1, b1, w2, b2, *, max_tile=4096):
    """Batched forward + greedy action.

    x: (B, in_features) f32.  Params in PyTorch layout:
      w1 (hidden, in), b1 (hidden, 1), w2 (n_actions, hidden), b2 (n_actions, 1).
    Returns (q_values (B, n_actions) f32, actions (B,) int32).
    """
    B, in_features = x.shape
    n_actions, hidden = w2.shape

    # Batch-on-lanes tile: multiple of 128 lanes; single grid step for small
    # batches (overhead-bound regime), 4096-lane chunks for big replay batches
    # (keeps f32 hT + double-buffered blocks far inside v7x's 64 MiB VMEM).
    tb = min(max_tile, pl.cdiv(B, 128) * 128)
    nb = pl.cdiv(B, tb)
    B_pad = nb * tb

    # One wrapper-side transpose/pad of the tiny obs tensor (feature-major).
    xT = x.T
    if B_pad != B:
        xT = jnp.pad(xT, ((0, 0), (0, B_pad - B)))

    qT, actT = pl.pallas_call(
        mlp_act_kernel,
        out_shape=(
            jax.ShapeDtypeStruct((n_actions, B_pad), jnp.float32),
            jax.ShapeDtypeStruct((1, B_pad), jnp.int32),
        ),
        grid=(nb,),
        in_specs=[
            # Only the xT tile streams per grid step.
            pl.BlockSpec((in_features, tb), lambda i: (0, i)),
            # Weights / biases: grid-invariant -> VMEM-resident across steps.
            pl.BlockSpec(w1.shape, lambda i: (0, 0)),
            pl.BlockSpec(b1.shape, lambda i: (0, 0)),
            pl.BlockSpec(w2.shape, lambda i: (0, 0)),
            pl.BlockSpec(b2.shape, lambda i: (0, 0)),
        ],
        out_specs=(
            pl.BlockSpec((n_actions, tb), lambda i: (0, i)),
            pl.BlockSpec((1, tb), lambda i: (0, i)),
        ),
        compiler_params=pltpu.CompilerParams(
            # Independent batch tiles: shards across v7x's 2 TensorCores when
            # nb > 1 (large batches); neutral on single-TC v5e/v6e and nb == 1.
            dimension_semantics=("parallel",),
        ),
    )(xT, w1, b1, w2, b2)

    q = qT[:, :B].T          # back to module-compatible (B, n_actions)
    actions = actT[0, :B]
    return q, actions


def init_params(key, in_features, hidden, n_actions):
    # PyTorch nn.Linear default init: U(-1/sqrt(fan_in), 1/sqrt(fan_in)),
    # weights kept in PyTorch-native (out, in) layout.
    k1, k2, k3, k4 = jax.random.split(key, 4)
    lim1 = 1.0 / jnp.sqrt(jnp.float32(in_features))
    lim2 = 1.0 / jnp.sqrt(jnp.float32(hidden))
    w1 = jax.random.uniform(k1, (hidden, in_features), jnp.float32, -lim1, lim1)
    b1 = jax.random.uniform(k2, (hidden, 1), jnp.float32, -lim1, lim1)
    w2 = jax.random.uniform(k3, (n_actions, hidden), jnp.float32, -lim2, lim2)
    b2 = jax.random.uniform(k4, (n_actions, 1), jnp.float32, -lim2, lim2)
    return w1, b1, w2, b2


if __name__ == "__main__":
    # CartPole-v0: observation dim = 4, action space = 2.
    in_features, hidden, n_actions = 4, 64, 2
    batch = 256   # batched acting / replay-sample forward

    key = jax.random.PRNGKey(0)
    kx, kp = jax.random.split(key)
    x = jax.random.normal(kx, (batch, in_features), jnp.float32)
    w1, b1, w2, b2 = init_params(kp, in_features, hidden, n_actions)

    # Single jitted act/step entry point: params stay on-device, one dispatch.
    fwd = jax.jit(dqn_forward)
    q_values, actions = fwd(x, w1, b1, w2, b2)
    q_values, actions = jax.block_until_ready((q_values, actions))

    assert q_values.shape == (batch, n_actions)
    assert q_values.dtype == jnp.float32
    assert actions.shape == (batch,)
    assert actions.dtype == jnp.int32

    # Reference mirroring the kernel's bf16-matmul / f32-accumulate numerics.
    h_ref = jnp.tanh(
        jnp.dot(x.astype(jnp.bfloat16), w1.T.astype(jnp.bfloat16),
                preferred_element_type=jnp.float32) + b1[:, 0])
    q_ref = jnp.dot(h_ref.astype(jnp.bfloat16), w2.T.astype(jnp.bfloat16),
                    preferred_element_type=jnp.float32) + b2[:, 0]
    assert jnp.allclose(q_values, q_ref, atol=1e-2, rtol=1e-2)

    # Sanity vs. the pure-f32 PyTorch-module semantics (bf16 rounding only).
    q_f32 = jnp.tanh(x @ w1.T + b1[:, 0]) @ w2.T + b2[:, 0]
    assert jnp.allclose(q_values, q_f32, atol=5e-2, rtol=5e-2)

    # Fused `act` path matches argmax over the same Q values (first-max ties).
    assert jnp.array_equal(actions, jnp.argmax(q_values, axis=1).astype(jnp.int32))

    # TODO(synk): gym env stepping / replay buffer / epsilon-greedy schedule are
    # host-side control flow, not kernel work.

    print("KERNEL_OK")
</pallas_src>

<mosaic_0001>
module attributes {stable_mosaic.version = 11 : i64} {
  func.func @mlp_act_kernel(%arg0: i32, %arg1: memref<4x256xf32, #tpu.memory_space<vmem>>, %arg2: memref<64x4xf32, #tpu.memory_space<vmem>>, %arg3: memref<64x1xf32, #tpu.memory_space<vmem>>, %arg4: memref<2x64xf32, #tpu.memory_space<vmem>>, %arg5: memref<2x1xf32, #tpu.memory_space<vmem>>, %arg6: memref<2x256xf32, #tpu.memory_space<vmem>>, %arg7: memref<1x256xi32, #tpu.memory_space<vmem>>) attributes {dimension_semantics = [#tpu.dimension_semantics<parallel>], iteration_bounds = array<i64: 1>, scalar_prefetch = 0 : i64, scratch_operands = 0 : i64, tpu.core_type = #tpu.core_type<tc>, window_params = [{transform_indices = @transform_0, window_bounds = array<i64: 4, 256>}, {pipeline_mode = #tpu.pipeline_mode<synchronous>, transform_indices = @transform_1, window_bounds = array<i64: 64, 4>}, {pipeline_mode = #tpu.pipeline_mode<synchronous>, transform_indices = @transform_2, window_bounds = array<i64: 64, 1>}, {pipeline_mode = #tpu.pipeline_mode<synchronous>, transform_indices = @transform_3, window_bounds = array<i64: 2, 64>}, {pipeline_mode = #tpu.pipeline_mode<synchronous>, transform_indices = @transform_4, window_bounds = array<i64: 2, 1>}, {transform_indices = @transform_5, window_bounds = array<i64: 2, 256>}, {transform_indices = @transform_6, window_bounds = array<i64: 1, 256>}]} {
    %c0 = arith.constant 0 : index
    %c0_0 = arith.constant 0 : index
    %0 = vector.load %arg1[%c0, %c0_0] : memref<4x256xf32, #tpu.memory_space<vmem>>, vector<4x256xf32>
    %1 = arith.truncf %0 : vector<4x256xf32> to vector<4x256xbf16>
    %c0_1 = arith.constant 0 : index
    %c0_2 = arith.constant 0 : index
    %2 = vector.load %arg2[%c0_1, %c0_2] : memref<64x4xf32, #tpu.memory_space<vmem>>, vector<64x4xf32>
    %3 = arith.truncf %2 : vector<64x4xf32> to vector<64x4xbf16>
    %cst = arith.constant dense<0.000000e+00> : vector<64x256xf32>
    %4 = tpu.matmul %3, %1, %cst {dimension_numbers = #tpu.dot_dimension_numbers<[1], [0], [0], [1], [0, 0, 1, 1], [], []>} : vector<64x4xbf16>, vector<4x256xbf16>, vector<64x256xf32> -> vector<64x256xf32>
    %c0_3 = arith.constant 0 : index
    %c0_4 = arith.constant 0 : index
    %5 = vector.load %arg3[%c0_3, %c0_4] : memref<64x1xf32, #tpu.memory_space<vmem>>, vector<64x1xf32>
    %6 = vector.broadcast %5 : vector<64x1xf32> to vector<64x256xf32>
    %7 = arith.addf %4, %6 : vector<64x256xf32>
    %8 = math.tanh %7 : vector<64x256xf32>
    %c0_5 = arith.constant 0 : index
    %c0_6 = arith.constant 0 : index
    %9 = vector.load %arg4[%c0_5, %c0_6] : memref<2x64xf32, #tpu.memory_space<vmem>>, vector<2x64xf32>
    %10 = arith.truncf %9 : vector<2x64xf32> to vector<2x64xbf16>
    %11 = arith.truncf %8 : vector<64x256xf32> to vector<64x256xbf16>
    %cst_7 = arith.constant dense<0.000000e+00> : vector<2x256xf32>
    %12 = tpu.matmul %10, %11, %cst_7 {dimension_numbers = #tpu.dot_dimension_numbers<[1], [0], [0], [1], [0, 0, 1, 1], [], []>} : vector<2x64xbf16>, vector<64x256xbf16>, vector<2x256xf32> -> vector<2x256xf32>
    %c0_8 = arith.constant 0 : index
    %c0_9 = arith.constant 0 : index
    %13 = vector.load %arg5[%c0_8, %c0_9] : memref<2x1xf32, #tpu.memory_space<vmem>>, vector<2x1xf32>
    %14 = vector.broadcast %13 : vector<2x1xf32> to vector<2x256xf32>
    %15 = arith.addf %12, %14 : vector<2x256xf32>
    %c0_10 = arith.constant 0 : index
    %c0_11 = arith.constant 0 : index
    %16 = vector.load %arg6[%c0_10, %c0_11] : memref<2x256xf32, #tpu.memory_space<vmem>>, vector<2x256xf32>
    tpu.vector_store %arg6[%c0_10, %c0_11], %15 {strides = array<i32>} : memref<2x256xf32, #tpu.memory_space<vmem>>, vector<2x256xf32>,
    %17 = vector.extract_strided_slice %15 {offsets = [1, 0], sizes = [1, 256], strides = [1, 1]} : vector<2x256xf32> to vector<1x256xf32>
    %18 = vector.extract_strided_slice %15 {offsets = [0, 0], sizes = [1, 256], strides = [1, 1]} : vector<2x256xf32> to vector<1x256xf32>
    %19 = arith.cmpf ogt, %17, %18 : vector<1x256xf32>
    %20 = arith.extui %19 : vector<1x256xi1> to vector<1x256xi32>
    %c0_12 = arith.constant 0 : index
    %c0_13 = arith.constant 0 : index
    %21 = vector.load %arg7[%c0_12, %c0_13] : memref<1x256xi32, #tpu.memory_space<vmem>>, vector<1x256xi32>
    tpu.vector_store %arg7[%c0_12, %c0_13], %20 {strides = array<i32>} : memref<1x256xi32, #tpu.memory_space<vmem>>, vector<1x256xi32>,
    return
  }
  func.func @transform_0(%arg0: i32) -> (i32, i32) {
    %c0_i32 = arith.constant 0 : i32
    %c0_i32_0 = arith.constant 0 : i32
    return %c0_i32, %arg0 : i32, i32
  }
  func.func @transform_1(%arg0: i32) -> (i32, i32) {
    %c0_i32 = arith.constant 0 : i32
    %c0_i32_0 = arith.constant 0 : i32
    %c0_i32_1 = arith.constant 0 : i32
    return %c0_i32, %c0_i32_0 : i32, i32
  }
  func.func @transform_2(%arg0: i32) -> (i32, i32) {
    %c0_i32 = arith.constant 0 : i32
    %c0_i32_0 = arith.constant 0 : i32
    %c0_i32_1 = arith.constant 0 : i32
    return %c0_i32, %c0_i32_0 : i32, i32
  }
  func.func @transform_3(%arg0: i32) -> (i32, i32) {
    %c0_i32 = arith.constant 0 : i32
    %c0_i32_0 = arith.constant 0 : i32
    %c0_i32_1 = arith.constant 0 : i32
    return %c0_i32, %c0_i32_0 : i32, i32
  }
  func.func @transform_4(%arg0: i32) -> (i32, i32) {
    %c0_i32 = arith.constant 0 : i32
    %c0_i32_0 = arith.constant 0 : i32
    %c0_i32_1 = arith.constant 0 : i32
    return %c0_i32, %c0_i32_0 : i32, i32
  }
  func.func @transform_5(%arg0: i32) -> (i32, i32) {
    %c0_i32 = arith.constant 0 : i32
    %c0_i32_0 = arith.constant 0 : i32
    return %c0_i32, %arg0 : i32, i32
  }
  func.func @transform_6(%arg0: i32) -> (i32, i32) {
    %c0_i32 = arith.constant 0 : i32
    %c0_i32_0 = arith.constant 0 : i32
    return %c0_i32, %arg0 : i32, i32
  }
}

</mosaic_0001>

<bundles_post_ra>
// kernel: dqn_forward.1
= control target key start
LH: loop header
LB: loop body
LE: loop exit
PB: predicated region body
PF: predicated region fallthrough
CT: control target
= control target key end

     0   :  { %12 = vsyncpa [#allocation3], 0  ;;  %vm104_vm0 = vcmask 1041408   ;;  %v424_v3 = vmov 0   ;;  %vm91_vm1 = vcmask 31744   ;;  %s559_s0 = inlined_call_operand.vmem [shape: f32[4,256], index: 0, kind: input, shape index: {}]   ;;  %s560_s1 = inlined_call_operand.vmem [shape: f32[64,4], index: 1, kind: input, shape index: {}]   ;;  %s561_s2 = inlined_call_operand.vmem [shape: f32[64,1], index: 2, kind: input, shape index: {}]   ;;  %s562_s3 = inlined_call_operand.vmem [shape: f32[2,64], index: 3, kind: input, shape index: {}]   ;;  %s563_s4 = inlined_call_operand.vmem [shape: f32[2,1], index: 4, kind: input, shape index: {}]   ;;  %s564_s5 = inlined_call_operand.hbm [shape: f32[2,256], index: 5, kind: output, shape index: {0}]   ;;  %s565_s6 = inlined_call_operand.hbm [shape: s32[1,256], index: 6, kind: output, shape index: {1}]  }
   0x1   :  { %v25_v0 = vld [vmem:[%s559_s0] sm:$0xff]  ;;  %143 = vmatprep.mubr.bf16.mxu0 %v424_v3  ;;  %341 = vset.pattern.permute.xlu0 %v424_v3  ;;  %v32_v5 = vld [vmem:[%s560_s1 + $0x8] sm:$0xff]  ;;  %v45_v9 = vld [vmem:[%s561_s2 + $0x10] sm:$0xff] }
   0x2   :  { %v27_v1 = vcombine.high %v25_v0, %v25_v0  ;;  %v29_v2 = vpack.c.bf16 %v25_v0, %v25_v0  ;;  %v31_v4 = vld [vmem:[%s560_s1] sm:$0xff]  ;;  %342 = vset.pattern.permute.xlu1 %v424_v3  ;;  %252 = vmatprep.mubr.bf16.mxu1 %v424_v3  ;;  %v44_v11 = vld [vmem:[%s561_s2 + $0x8] sm:$0xff]  ;;  %v46_v12 = vld [vmem:[%s561_s2 + $0x18] sm:$0xff] }
   0x3   :  { %v43_v8 = vld [vmem:[%s561_s2] sm:$0xff]  ;;  %63 = vperm.xlu1 %342, %v45_v9   ;;  %v39_v10 = vpack.c.bf16 %v32_v5, %v31_v4 }
   0x4   :  { %v30_v6 = vpack.c.bf16 %v27_v1, %v27_v1  ;;  %v106_v7 = vsel %vm104_vm0, %v29_v2, 0  ;;  %53 = vperm.xlu0 %341, %v43_v8  }
   0x6   :  { %330 = vmatprep.subr.msk.bf16.mxu0 %vm104_vm0, %v30_v6 }
   0x7   :  { %112 = vmatpush1.bf16.msra.mxu0 %v106_v7 }
   0x8   :  { %13 = vsyncpa [#allocation5], 0  ;;  %58 = vperm.xlu0 %341, %v44_v11   ;;  %68 = vperm.xlu1 %342, %v46_v12   ;;  %v47_v13 = vld [vmem:[%s561_s2 + $0x20] sm:$0xff]  ;;  %v48_v14 = vld [vmem:[%s561_s2 + $0x28] sm:$0xff]  ;;  %vm216_vm2 = vcmask 523264   ;;  %s426_s30 = smov [#allocation2]  }
   0x9   :  { %v33_v15 = vld [vmem:[%s560_s1 + $0x10] sm:$0xff]  ;;  %v34_v16 = vld [vmem:[%s560_s1 + $0x18] sm:$0xff]  ;;  %v210_v20 = vld [vmem:[%s563_s4] sm:$0x3]  ;;  %s308_s7 = sshll.u32 %s426_s30, 4  ;;  %s309_s7 = int_to_ptr.vmem [resolvable:$true] %s308_s7 }
   0xa   :  { %331 = vmatmul.mubr.msk.bf16.vlgmr.msra.gmra.mrb[0].mxu0 %vm91_vm1, %v39_v10  ;;  %v40_v17 = vpack.c.bf16 %v34_v16, %v33_v15  ;;  %v49_v18 = vld [vmem:[%s561_s2 + $0x30] sm:$0xff]  ;;  %v50_v19 = vld [vmem:[%s561_s2 + $0x38] sm:$0xff]  ;;  %v35_v21 = vld [vmem:[%s560_s1 + $0x20] sm:$0xff]  ;;  %p381_p1 = scmp.lt.s32.totalorder %s309_s7, %s309_s7 }
   0xb   :  { %153 = vmatprep.mubr.bf16.mxu0 %v424_v3  ;;  %v36_v22 = vld [vmem:[%s560_s1 + $0x28] sm:$0xff]  ;;  %v37_v24 = vld [vmem:[%s560_s1 + $0x30] sm:$0xff]  ;;  %v38_v25 = vld [vmem:[%s560_s1 + $0x38] sm:$0xff] }
   0xc   :  { %73 = vperm.xlu0 %341, %v47_v13   ;;  %78 = vperm.xlu1 %342, %v48_v14   ;;  %v41_v23 = vpack.c.bf16 %v36_v22, %v35_v21  ;;  %v42_v26 = vpack.c.bf16 %v38_v25, %v37_v24 }
  0x10   :  { %83 = vperm.xlu0 %341, %v49_v18   ;;  %88 = vperm.xlu1 %342, %v50_v19  }
  0x12   :  { %332 = vmatmul.mubr.msk.bf16.gmra.mrb[4].mxu0 %vm91_vm1, %v40_v17 }
  0x13   :  { %163 = vmatprep.mubr.bf16.mxu0 %v424_v3 }
  0x14   :  { %213 = vperm.xlu0 %341, %v210_v20  }
  0x1a   :  { %333 = vmatmul.mubr.msk.bf16.gmra.mrb[8].mxu0 %vm91_vm1, %v41_v23 }
  0x1b   :  { %173 = vmatprep.mubr.bf16.mxu0 %v424_v3 }
  0x22   :  { %334 = vmatmul.mubr.msk.bf16.gmra.mrb[12].mxu0 %vm91_vm1, %v42_v26 }
  0x82   :  { %v64_v36 = vpop.permute.xlu1 %63 }
  0x83   :  { %v54_v27 = vpop.permute.xlu0 %53 }
  0x87   :  { %v59_v31 = vpop.permute.xlu0 %58  ;;  %v69_v41 = vpop.permute.xlu1 %68 }
  0x8b   :  { %v74_v51 = vpop.permute.xlu0 %73  ;;  %v79_v57 = vpop.permute.xlu1 %78 }
  0x8f   :  { %v84_v4 = vpop.permute.xlu0 %83  ;;  %v89_v10 = vpop.permute.xlu1 %88 }
  0xdd   :  { %v145_v28 = vpop.f32.mrb[0].mxu0 }
  0xde   :  { %v146_v29 = vadd.f32 %v145_v28, %v54_v27  ;;  %v147_v30 = vpop.f32.mrb[1].mxu0 }
  0xdf   :  { %v148_v32 = vadd.f32 %v147_v30, %v54_v27  ;;  %v149_v33 = vpop.f32.mrb[2].mxu0  ;;  %v200_v27 = vld [vmem:[%s562_s3] sm:$0x3]  ;;  %v425_v30 = vmov 1966171168   ;;  %s376_s3 = scalar_lea.vmem %s309_s7, 64 }
  0xe0   :  { %344 = vtanh.f32 %v146_v29  ;;  %v150_v34 = vadd.f32 %v149_v33, %v59_v31  ;;  %v151_v35 = vpop.f32.mrb[3].mxu0  ;;  %v201_v29 = vpack.c.bf16 %v200_v27, %v200_v27  ;;  %v214_v33 = vpop.permute.xlu0 %213  ;;  %p377_p0 = scmp.ne.s32.totalorder %s309_s7, %s376_s3  ;;  %p382_p2 = scmp.lt.s32.totalorder %s376_s3, %s376_s3 }
  0xe1   :  { %346 = vtanh.f32 %v148_v32  ;;  %v152_v37 = vadd.f32 %v151_v35, %v59_v31  ;;  %v283_v31 = vunpack.c.l.s4 %v425_v30  ;;  %v285_v32 = vlaneseq }
  0xe2   :  { %348 = vtanh.f32 %v150_v34  ;;  %p383_p3 = por %p382_p2, %p381_p1 }
  0xe3   :  { %350 = vtanh.f32 %v152_v37 }
  0xe4   :  { %p384_p4 = pnand %p383_p3, %p377_p0 }
  0xe5   :  { %v155_v38 = vpop.f32.mrb[4].mxu0 }
  0xe6   :  { %v156_v39 = vadd.f32 %v155_v38, %v64_v36  ;;  %v157_v40 = vpop.f32.mrb[5].mxu0 }
  0xe7   :  { %v158_v42 = vadd.f32 %v157_v40, %v64_v36  ;;  %v159_v43 = vpop.f32.mrb[6].mxu0  ;;  %v286_v40 = vshrl.u32 %v285_v32, 7 }
  0xe8   :  { %352 = vtanh.f32 %v156_v39  ;;  %v160_v44 = vadd.f32 %v159_v43, %v69_v41  ;;  %v161_v45 = vpop.f32.mrb[7].mxu0  ;;  %v284_v39 = vunpack.c.0.s8 %v283_v31 }
  0xe9   :  { %354 = vtanh.f32 %v158_v42  ;;  %v162_v46 = vadd.f32 %v161_v45, %v69_v41 }
  0xea   :  { %v345_v47 = vpop.eup %344  ;;  %356 = vtanh.f32 %v160_v44 }
  0xeb   :  { %v347_v48 = vpop.eup %346  ;;  %358 = vtanh.f32 %v162_v46  ;;  %v287_v46 = vsub.s32 %v284_v39, %v286_v40 }
  0xec   :  { %v349_v49 = vpop.eup %348 }
  0xed   :  { %v351_v50 = vpop.eup %350  ;;  %v165_v52 = vpop.f32.mrb[8].mxu0  ;;  %v202_v53 = vpack.c.bf16 %v349_v49, %v345_v47 }
  0xee   :  { %v166_v54 = vadd.f32 %v165_v52, %v74_v51  ;;  %v167_v55 = vpop.f32.mrb[9].mxu0  ;;  %v203_v56 = vpack.c.bf16 %v351_v50, %v347_v48 }
  0xef   :  { %v168_v58 = vadd.f32 %v167_v55, %v74_v51  ;;  %v169_v59 = vpop.f32.mrb[10].mxu0 }
  0xf0   :  { %360 = vtanh.f32 %v166_v54  ;;  %v170_v60 = vadd.f32 %v169_v59, %v79_v57  ;;  %v171_v61 = vpop.f32.mrb[11].mxu0  ;;  %220 = vmatprep.subr.bf16.mxu1 %v203_v56 }
  0xf1   :  { %362 = vtanh.f32 %v168_v58  ;;  %v172_v62 = vadd.f32 %v171_v61, %v79_v57  ;;  %221 = vmatpush1.bf16.msra.mxu1 %v202_v53 }
  0xf2   :  { %v353_v63 = vpop.eup %352  ;;  %364 = vtanh.f32 %v170_v60 }
  0xf3   :  { %v355_v0 = vpop.eup %354  ;;  %366 = vtanh.f32 %v172_v62 }
  0xf4   :  { %v357_v1 = vpop.eup %356 }
  0xf5   :  { %v359_v2 = vpop.eup %358  ;;  %v175_v5 = vpop.f32.mrb[12].mxu0  ;;  %v204_v6 = vpack.c.bf16 %v357_v1, %v353_v63 }
  0xf6   :  { %v176_v7 = vadd.f32 %v175_v5, %v84_v4  ;;  %v177_v8 = vpop.f32.mrb[13].mxu0  ;;  %v205_v9 = vpack.c.bf16 %v359_v2, %v355_v0 }
  0xf7   :  { %v178_v11 = vadd.f32 %v177_v8, %v84_v4  ;;  %v179_v12 = vpop.f32.mrb[14].mxu0 }
  0xf8   :  { %368 = vtanh.f32 %v176_v7  ;;  %v180_v13 = vadd.f32 %v179_v12, %v89_v10  ;;  %v181_v14 = vpop.f32.mrb[15].mxu0  ;;  %222 = vmatprep.subr.bf16.mxu1 %v205_v9 }
  0xf9   :  { %370 = vtanh.f32 %v178_v11  ;;  %v182_v15 = vadd.f32 %v181_v14, %v89_v10  ;;  %223 = vmatpush1.bf16.msra.mxu1 %v204_v6 }
  0xfa   :  { %v361_v16 = vpop.eup %360  ;;  %372 = vtanh.f32 %v180_v13 }
  0xfb   :  { %v363_v17 = vpop.eup %362  ;;  %374 = vtanh.f32 %v182_v15 }
  0xfc   :  { %v365_v18 = vpop.eup %364 }
  0xfd   :  { %v367_v19 = vpop.eup %366  ;;  %v206_v20 = vpack.c.bf16 %v365_v18, %v361_v16 }
  0xfe   :  { %v207_v21 = vpack.c.bf16 %v367_v19, %v363_v17 }
 0x100   :  { %224 = vmatprep.subr.bf16.mxu1 %v207_v21 }
 0x101   :  { %225 = vmatpush1.bf16.msra.mxu1 %v206_v20 }
 0x102   :  { %v369_v22 = vpop.eup %368 }
 0x103   :  { %v371_v23 = vpop.eup %370 }
 0x104   :  { %v373_v24 = vpop.eup %372 }
 0x105   :  { %v375_v25 = vpop.eup %374  ;;  %v208_v26 = vpack.c.bf16 %v373_v24, %v369_v22 }
 0x106   :  { %v209_v28 = vpack.c.bf16 %v375_v25, %v371_v23 }
 0x108   :  { %226 = vmatprep.subr.bf16.mxu1 %v209_v28 }
 0x109   :  { %227 = vmatpush1.bf16.msra.mxu1 %v208_v26 }
 0x10c   :  { %335 = vmatmul.mubr.msk.bf16.vlgmr.msra.gmra.mrb[0].mxu1 %vm216_vm2, %v201_v29 }
 0x1df   :  { %v254_v34 = vpop.f32.mrb[0].mxu1 }
 0x1e0   :  { %v255_v35 = vadd.f32 %v254_v34, %v214_v33  ;;  %v256_v36 = vpop.f32.mrb[1].mxu1 }
 0x1e1   :  { %v257_v37 = vadd.f32 %v256_v36, %v214_v33  ;;  %v258_v38 = vpop.f32.mrb[2].mxu1 }
 0x1e2   :  { %v273_v41 = vrot.slane %v255_v35, 7  ;;  %v259_v42 = vpop.f32.mrb[3].mxu1 }
 0x1e3   :  { %v274_v43 = vrot.slane %v257_v37, 7  ;;  %v263_v44 = vcombine.low %v255_v35, %v257_v37 }
 0x1e4   :  { %vm277_vm3 = vcmp.gt.f32.partialorder %v255_v35, %v273_v41 }
 0x1e5   :  { %v279_v45 = vsel %vm277_vm3, 1, %v424_v3  ;;  %vm278_vm4 = vcmp.gt.f32.partialorder %v257_v37, %v274_v43  ;;  %336 = vst.sshfl [vmem:[#allocation2] sm:$0x33 pattern:$0x76325410] %v263_v44 }
 0x1e6   :  { %v280_v47 = vsel %vm278_vm4, 1, %v424_v3 }
 0x1e7   :  { %387 = shalt.err (!%p384_p4)
}
 0x1e8   :  { %s388_s10 = scalar_lea.hbm %s564_s5, 64 }
 0x1e9   :  { %p389_p5 = scmp.ne.s32.totalorder %s564_s5, %s388_s10  ;;  %p392_p6 = scmp.lt.u32.totalorder %s388_s10, %s564_s5 }
 0x1eb   :  { %p394_p7 = pnand %p392_p6, %p389_p5 }
 0x1ed   :  { %397 = shalt.err (!%p394_p7)
}
 0x1ee   :  { %311 = dma.vmem_to_hbm [thread:$0]  %s309_s7, 64, %s564_s5, [#allocation3]   ;;  %v281_v3 = vcombine.low %v279_v45, %v280_v47  ;;  %vm299_vm5 = vcmp.lt.s32.totalorder %v285_v32, 256 }
 0x1ef   :  { %s427_s17 = smov [#allocation4]  }
 0x1f0   :  { %v288_v48 = vrot.slane %v281_v3, %v287_v46  ;;  %s318_s18 = sshll.u32 %s427_s17, 4  ;;  %s319_s18 = int_to_ptr.vmem [resolvable:$true] %s318_s18 }
 0x1f1   :  { %s398_s19 = scalar_lea.vmem %s319_s18, 32  ;;  %p403_p9 = scmp.lt.s32.totalorder %s319_s18, %s319_s18 }
 0x1f2   :  { %v289_v49 = vcombine.high %v288_v48, %v288_v48  ;;  %p399_p8 = scmp.ne.s32.totalorder %s319_s18, %s398_s19  ;;  %p404_p10 = scmp.lt.s32.totalorder %s398_s19, %s398_s19 }
 0x1f4   :  { %v296_v50 = vrot.slane %v289_v49, %v287_v46  ;;  %p405_p11 = por %p404_p10, %p403_p9 }
 0x1f6   :  { %301 = vst.msk [vmem:[#allocation4] sm:$0x3] %vm299_vm5, %v296_v50  ;;  %p406_p12 = pnand %p405_p11, %p399_p8 }
 0x1f8   :  { %409 = shalt.err (!%p406_p12)
}
 0x1f9   :  { %s410_s5 = scalar_lea.hbm %s565_s6, 32 }
 0x1fa   :  { %p411_p13 = scmp.ne.s32.totalorder %s565_s6, %s410_s5  ;;  %p414_p0 = scmp.lt.u32.totalorder %s410_s5, %s565_s6 }
 0x1fc   :  { %p416_p1 = pnand %p414_p0, %p411_p13 }
 0x1fe   :  { %419 = shalt.err (!%p416_p1)
}
 0x1ff   :  { %321 = dma.vmem_to_hbm [thread:$0]  %s319_s18, 32, %s565_s6, [#allocation5]  }
 0x200   :  { %420 = dma.done.wait [#allocation3], 64  }
 0x201   :  { %421 = vsyncadd [#allocation3], 4294967232 }
 0x202   :  { %422 = dma.done.wait [#allocation5], 32  }
 0x203   :  { %423 = vsyncadd [#allocation5], 4294967264 }
 0x204   :  { %328 = vsyncpa [#allocation3], 1 }
 0x205   :  { %329 = vsyncpa [#allocation5], 1 }

</bundles_post_ra>
